<compile_context>
chip_gen: v6e
topology: v6e:2x2x1
jax: 0.10.0
libtpu: 0.0.40
codegen_flags: <defaults>
</compile_context>

<pallas_src>
import jax
import jax.numpy as jnp
from jax.experimental import pallas as pl
from jax.experimental.pallas import tpu as pltpu


def _round_up(n, m):
    return ((n + m - 1) // m) * m


def mlp_kernel(x_ref, w1_ref, b1_ref, w2_ref, b2_ref, o_ref):
    # fc1: (TILE_B, D_in) @ (D_in, H_pad) -> MXU, f32 accumulate.
    h = jnp.dot(x_ref[...], w1_ref[...], preferred_element_type=jnp.float32)
    # Bias add + sigmoid in f32 on the VPU/EUP (biases stay f32).
    h = jax.nn.sigmoid(h + b1_ref[...])
    # fc2: downcast activations to the weight dtype (bf16) for the native MXU
    # path; accumulate in f32.
    out = jnp.dot(h.astype(w2_ref.dtype), w2_ref[...],
                  preferred_element_type=jnp.float32)
    o_ref[...] = (out + b2_ref[...]).astype(o_ref.dtype)


def mlp_forward(x, w1, b1, w2, b2, *, max_tile_b=256,
                compute_dtype=jnp.bfloat16, out_dtype=jnp.float32):
    """x:(B,D_in), w1:(D_in,H), b1:(1,H), w2:(H,O), b2:(1,O) -> (B,O)."""
    B, D_in = x.shape
    H = w1.shape[1]
    O = w2.shape[1]

    LANE = 128
    SUB = 16  # bf16 sublane packing

    H_pad = _round_up(H, LANE)
    O_pad = _round_up(O, LANE)

    # Batch tiling: big batches are tiled at max_tile_b rows per grid step
    # (keeps the MXU M-dim full and pipelines x / out DMAs); small batches are
    # a single sublane-aligned tile.
    tile_b = max_tile_b if B > max_tile_b else _round_up(B, SUB)
    B_pad = _round_up(B, tile_b)
    grid = (B_pad // tile_b,)

    # Zero-pad everything to lane-dense shapes; math is unchanged (see header).
    xp = jnp.zeros((B_pad, D_in), compute_dtype).at[:B].set(x.astype(compute_dtype))
    w1p = jnp.zeros((D_in, H_pad), compute_dtype).at[:, :H].set(w1.astype(compute_dtype))
    b1p = jnp.zeros((1, H_pad), jnp.float32).at[:, :H].set(b1.astype(jnp.float32))
    w2p = jnp.zeros((H_pad, O_pad), compute_dtype).at[:H, :O].set(w2.astype(compute_dtype))
    b2p = jnp.zeros((1, O_pad), jnp.float32).at[:, :O].set(b2.astype(jnp.float32))

    itemsize = jnp.dtype(compute_dtype).itemsize
    cost = pl.CostEstimate(
        flops=2 * B_pad * (D_in * H_pad + H_pad * O_pad),
        transcendentals=B_pad * H_pad,                       # sigmoid exp
        bytes_accessed=(xp.size + w1p.size + w2p.size) * itemsize
                       + (b1p.size + b2p.size) * 4
                       + B_pad * O_pad * jnp.dtype(out_dtype).itemsize,
    )

    out_padded = pl.pallas_call(
        mlp_kernel,
        out_shape=jax.ShapeDtypeStruct((B_pad, O_pad), out_dtype),
        grid_spec=pltpu.PrefetchScalarGridSpec(
            num_scalar_prefetch=0,
            grid=grid,
            in_specs=[
                pl.BlockSpec((tile_b, D_in), lambda i: (i, 0)),   # x: batch-tiled
                pl.BlockSpec((D_in, H_pad), lambda i: (0, 0)),    # w1: resident
                pl.BlockSpec((1, H_pad), lambda i: (0, 0)),       # b1: resident
                pl.BlockSpec((H_pad, O_pad), lambda i: (0, 0)),   # w2: resident
                pl.BlockSpec((1, O_pad), lambda i: (0, 0)),       # b2: resident
            ],
            out_specs=pl.BlockSpec((tile_b, O_pad), lambda i: (i, 0)),
        ),
        compiler_params=pltpu.CompilerParams(
            # Batch axis is independent -> shard across TensorCores on v7x.
            dimension_semantics=("parallel",),
        ),
        cost_estimate=cost,
    )(xp, w1p, b1p, w2p, b2p)

    return out_padded[:B, :O]


def init_params(key, input_size, hidden_size, output_size, dtype=jnp.float32):
    """Deterministic init mirroring nn.Linear's default U(-1/sqrt(fan_in), +)."""
    k1, k2, k3, k4 = jax.random.split(key, 4)
    lim1 = 1.0 / jnp.sqrt(input_size)
    lim2 = 1.0 / jnp.sqrt(hidden_size)
    w1 = jax.random.uniform(k1, (input_size, hidden_size), dtype, -lim1, lim1)
    b1 = jax.random.uniform(k2, (1, hidden_size), dtype, -lim1, lim1)
    w2 = jax.random.uniform(k3, (hidden_size, output_size), dtype, -lim2, lim2)
    b2 = jax.random.uniform(k4, (1, output_size), dtype, -lim2, lim2)
    return w1, b1, w2, b2


if __name__ == "__main__":
    # Small shapes consistent with the module: batch=8, input_size=32,
    # hidden_size=100, output_size=2.
    batch, input_size, hidden_size, output_size = 8, 32, 100, 2

    key = jax.random.PRNGKey(0)
    kx, kp = jax.random.split(key)
    x = jax.random.normal(kx, (batch, input_size), jnp.float32)
    w1, b1, w2, b2 = init_params(kp, input_size, hidden_size, output_size)

    out = mlp_forward(x, w1, b1, w2, b2)
    out = jax.block_until_ready(out)
    assert out.shape == (batch, output_size)

    # Reference 1: plain JAX with the same bf16 operand casts + f32 accumulate
    # (tight tolerance — should match the kernel essentially exactly).
    x_bf = x.astype(jnp.bfloat16)
    w1_bf = w1.astype(jnp.bfloat16)
    w2_bf = w2.astype(jnp.bfloat16)
    h_ref = jax.nn.sigmoid(
        jnp.dot(x_bf, w1_bf, preferred_element_type=jnp.float32) + b1)
    ref_mixed = jnp.dot(h_ref.astype(jnp.bfloat16), w2_bf,
                        preferred_element_type=jnp.float32) + b2
    assert jnp.allclose(out, ref_mixed, atol=1e-3, rtol=1e-3)

    # Reference 2: full f32 reference (loose tolerance for bf16 operand rounding).
    ref_f32 = jax.nn.sigmoid(x @ w1 + b1) @ w2 + b2
    assert jnp.allclose(out, ref_f32, atol=5e-2, rtol=5e-2)

    print("KERNEL_OK")
</pallas_src>

<mosaic_0001>
module attributes {stable_mosaic.version = 11 : i64} {
  func.func @mlp_kernel(%arg0: i32, %arg1: memref<16x32xbf16, #tpu.memory_space<vmem>>, %arg2: memref<32x128xbf16, #tpu.memory_space<vmem>>, %arg3: memref<1x128xf32, #tpu.memory_space<vmem>>, %arg4: memref<128x128xbf16, #tpu.memory_space<vmem>>, %arg5: memref<1x128xf32, #tpu.memory_space<vmem>>, %arg6: memref<16x128xf32, #tpu.memory_space<vmem>>) attributes {dimension_semantics = [#tpu.dimension_semantics<parallel>], iteration_bounds = array<i64: 1>, scalar_prefetch = 0 : i64, scratch_operands = 0 : i64, tpu.core_type = #tpu.core_type<tc>, window_params = [{transform_indices = @transform_0, window_bounds = array<i64: 16, 32>}, {pipeline_mode = #tpu.pipeline_mode<synchronous>, transform_indices = @transform_1, window_bounds = array<i64: 32, 128>}, {pipeline_mode = #tpu.pipeline_mode<synchronous>, transform_indices = @transform_2, window_bounds = array<i64: 1, 128>}, {pipeline_mode = #tpu.pipeline_mode<synchronous>, transform_indices = @transform_3, window_bounds = array<i64: 128, 128>}, {pipeline_mode = #tpu.pipeline_mode<synchronous>, transform_indices = @transform_4, window_bounds = array<i64: 1, 128>}, {transform_indices = @transform_5, window_bounds = array<i64: 16, 128>}]} {
    %c0 = arith.constant 0 : index
    %c0_0 = arith.constant 0 : index
    %0 = vector.load %arg1[%c0, %c0_0] : memref<16x32xbf16, #tpu.memory_space<vmem>>, vector<16x32xbf16>
    %c0_1 = arith.constant 0 : index
    %c0_2 = arith.constant 0 : index
    %1 = vector.load %arg2[%c0_1, %c0_2] : memref<32x128xbf16, #tpu.memory_space<vmem>>, vector<32x128xbf16>
    %cst = arith.constant dense<0.000000e+00> : vector<16x128xf32>
    %2 = tpu.matmul %0, %1, %cst {dimension_numbers = #tpu.dot_dimension_numbers<[1], [0], [0], [1], [0, 0, 1, 1], [], []>} : vector<16x32xbf16>, vector<32x128xbf16>, vector<16x128xf32> -> vector<16x128xf32>
    %c0_3 = arith.constant 0 : index
    %c0_4 = arith.constant 0 : index
    %3 = vector.load %arg3[%c0_3, %c0_4] : memref<1x128xf32, #tpu.memory_space<vmem>>, vector<1x128xf32>
    %4 = vector.broadcast %3 : vector<1x128xf32> to vector<16x128xf32>
    %5 = arith.addf %2, %4 : vector<16x128xf32>
    %6 = arith.negf %5 : vector<16x128xf32>
    %7 = math.exp %6 : vector<16x128xf32>
    %cst_5 = arith.constant 1.000000e+00 : f32
    %8 = vector.broadcast %cst_5 : f32 to vector<16x128xf32>
    %9 = arith.addf %8, %7 : vector<16x128xf32>
    %10 = arith.divf %8, %9 : vector<16x128xf32>
    %11 = arith.truncf %10 : vector<16x128xf32> to vector<16x128xbf16>
    %c0_6 = arith.constant 0 : index
    %c0_7 = arith.constant 0 : index
    %12 = vector.load %arg4[%c0_6, %c0_7] : memref<128x128xbf16, #tpu.memory_space<vmem>>, vector<128x128xbf16>
    %cst_8 = arith.constant dense<0.000000e+00> : vector<16x128xf32>
    %13 = tpu.matmul %11, %12, %cst_8 {dimension_numbers = #tpu.dot_dimension_numbers<[1], [0], [0], [1], [0, 0, 1, 1], [], []>} : vector<16x128xbf16>, vector<128x128xbf16>, vector<16x128xf32> -> vector<16x128xf32>
    %c0_9 = arith.constant 0 : index
    %c0_10 = arith.constant 0 : index
    %14 = vector.load %arg5[%c0_9, %c0_10] : memref<1x128xf32, #tpu.memory_space<vmem>>, vector<1x128xf32>
    %15 = vector.broadcast %14 : vector<1x128xf32> to vector<16x128xf32>
    %16 = arith.addf %13, %15 : vector<16x128xf32>
    %c0_11 = arith.constant 0 : index
    %c0_12 = arith.constant 0 : index
    %17 = vector.load %arg6[%c0_11, %c0_12] : memref<16x128xf32, #tpu.memory_space<vmem>>, vector<16x128xf32>
    tpu.vector_store %arg6[%c0_11, %c0_12], %16 {strides = array<i32>} : memref<16x128xf32, #tpu.memory_space<vmem>>, vector<16x128xf32>,
    return
  }
  func.func @transform_0(%arg0: i32) -> (i32, i32) {
    %c0_i32 = arith.constant 0 : i32
    %c0_i32_0 = arith.constant 0 : i32
    return %arg0, %c0_i32 : i32, i32
  }
  func.func @transform_1(%arg0: i32) -> (i32, i32) {
    %c0_i32 = arith.constant 0 : i32
    %c0_i32_0 = arith.constant 0 : i32
    %c0_i32_1 = arith.constant 0 : i32
    return %c0_i32, %c0_i32_0 : i32, i32
  }
  func.func @transform_2(%arg0: i32) -> (i32, i32) {
    %c0_i32 = arith.constant 0 : i32
    %c0_i32_0 = arith.constant 0 : i32
    %c0_i32_1 = arith.constant 0 : i32
    return %c0_i32, %c0_i32_0 : i32, i32
  }
  func.func @transform_3(%arg0: i32) -> (i32, i32) {
    %c0_i32 = arith.constant 0 : i32
    %c0_i32_0 = arith.constant 0 : i32
    %c0_i32_1 = arith.constant 0 : i32
    return %c0_i32, %c0_i32_0 : i32, i32
  }
  func.func @transform_4(%arg0: i32) -> (i32, i32) {
    %c0_i32 = arith.constant 0 : i32
    %c0_i32_0 = arith.constant 0 : i32
    %c0_i32_1 = arith.constant 0 : i32
    return %c0_i32, %c0_i32_0 : i32, i32
  }
  func.func @transform_5(%arg0: i32) -> (i32, i32) {
    %c0_i32 = arith.constant 0 : i32
    %c0_i32_0 = arith.constant 0 : i32
    return %arg0, %c0_i32 : i32, i32
  }
}

</mosaic_0001>

<bundles_post_ra>
// kernel: tpu_custom_call.1
= control target key start
LH: loop header
LB: loop body
LE: loop exit
PB: predicated region body
PF: predicated region fallthrough
CT: control target
= control target key end

     0   :  { %10 = vsyncpa [#allocation3], 0  ;;  %s512_s0 = inlined_call_operand.hbm [shape: bf16[16,32], index: 0, kind: input, shape index: {}]   ;;  %s513_s1 = inlined_call_operand.hbm [shape: bf16[32,128], index: 1, kind: input, shape index: {}]   ;;  %s514_s2 = inlined_call_operand.vmem [shape: f32[1,128], index: 2, kind: input, shape index: {}]   ;;  %s515_s3 = inlined_call_operand.hbm [shape: bf16[128,128], index: 3, kind: input, shape index: {}]   ;;  %s516_s4 = inlined_call_operand.vmem [shape: f32[1,128], index: 4, kind: input, shape index: {}]   ;;  %s517_s5 = inlined_call_operand.hbm [shape: f32[16,128], index: 5, kind: output, shape index: {}]  }
   0x1   :  { %11 = vsyncpa [#allocation6], 0 }
   0x2   :  { %12 = vsyncpa [#allocation4], 0  ;;  %s454_s18 = smov [#allocation5]   ;;  %s455_s20 = smov [#allocation2]  }
   0x3   :  { %s30_s19 = sshll.u32 %s454_s18, 4  ;;  %s18_s21 = sshll.u32 %s455_s20, 4  ;;  %s31_s19 = int_to_ptr.vmem [resolvable:$true] %s30_s19  ;;  %s19_s21 = int_to_ptr.vmem [resolvable:$true] %s18_s21 }
   0x4   :  { %s376_s22 = scalar_lea.vmem %s31_s19, 256  ;;  %p381_p1 = scmp.lt.s32.totalorder %s31_s19, %s31_s19 }
   0x5   :  { %p377_p0 = scmp.ne.s32.totalorder %s31_s19, %s376_s22  ;;  %p382_p2 = scmp.lt.s32.totalorder %s376_s22, %s376_s22 }
   0x7   :  { %p383_p3 = por %p382_p2, %p381_p1 }
   0x9   :  { %p384_p4 = pnand %p383_p3, %p377_p0 }
   0xb   :  { %387 = shalt.err (!%p384_p4)
}
   0xc   :  { %s456_s23 = smov 64   ;;  %s457_s24 = smov 4  }
   0xd   :  { %36 = dma.hbm_to_vmem [thread:$0]  %s513_s1, 256, %s31_s19, [#allocation6], %s456_s23, %s456_s23, %s457_s24  }
   0xe   :  { %s396_s27 = scalar_lea.vmem %s19_s21, 128  ;;  %p401_p6 = scmp.lt.s32.totalorder %s19_s21, %s19_s21 }
   0xf   :  { %p397_p5 = scmp.ne.s32.totalorder %s19_s21, %s396_s27  ;;  %p402_p7 = scmp.lt.s32.totalorder %s396_s27, %s396_s27 }
  0x11   :  { %p403_p8 = por %p402_p7, %p401_p6 }
  0x13   :  { %p404_p9 = pnand %p403_p8, %p397_p5 }
  0x15   :  { %407 = shalt.err (!%p404_p9)
}
  0x16   :  { %24 = dma.hbm_to_vmem [thread:$0]  %s512_s0, 128, %s19_s21, [#allocation3], %s456_s23, %s456_s23, %s457_s24  }
  0x17   :  { %s458_s30 = smov [#allocation7]  }
  0x18   :  { %s44_s6 = sshll.u32 %s458_s30, 4  ;;  %s45_s6 = int_to_ptr.vmem [resolvable:$true] %s44_s6 }
  0x19   :  { %s416_s7 = scalar_lea.vmem %s45_s6, 1024  ;;  %p421_p11 = scmp.lt.s32.totalorder %s45_s6, %s45_s6 }
  0x1a   :  { %p417_p10 = scmp.ne.s32.totalorder %s45_s6, %s416_s7  ;;  %p422_p12 = scmp.lt.s32.totalorder %s416_s7, %s416_s7 }
  0x1c   :  { %p423_p13 = por %p422_p12, %p421_p11 }
  0x1e   :  { %p424_p0 = pnand %p423_p13, %p417_p10 }
  0x20   :  { %427 = shalt.err (!%p424_p0)
}
  0x21   :  { %50 = dma.hbm_to_vmem [thread:$0]  %s515_s3, 1024, %s45_s6, [#allocation6], %s456_s23, %s456_s23, %s457_s24  }
  0x22   :  { %448 = dma.done.wait [#allocation3], 128  }
  0x23   :  { %449 = vsyncadd [#allocation3], 4294967168 }
  0x24   :  { %450 = dma.done.wait [#allocation6], 1280  }
  0x25   :  { %451 = vsyncadd [#allocation6], 4294966016  ;;  %v459_v0 = vmov 0.0   ;;  %vm460_vm0 = vmmov 0   ;;  %v349_v1 = vld [vmem:[#allocation5 + $0x8] sm:$0xff]   ;;  %v350_v2 = vld [vmem:[#allocation5] sm:$0xff]  }
  0x26   :  { %311 = vmatprep.subr.bf16.mxu0 %v459_v0  ;;  %315 = vmatprep.mubr.msk.bf16.mxu0 %vm460_vm0, %v459_v0  ;;  %v351_v3 = vld [vmem:[#allocation2] sm:$0xff]   ;;  %vm93_vm1 = vcmask 261120   ;;  %v352_v4 = vld [vmem:[#allocation7 + $0x38] sm:$0xff]   ;;  %v353_v5 = vld [vmem:[#allocation7 + $0x30] sm:$0xff]   ;;  %s461_s10 = smov [#allocation8]  }
  0x27   :  { %319 = vmatprep.subr.bf16.mxu1 %v459_v0  ;;  %335 = vmatprep.mubr.msk.bf16.mxu1 %vm460_vm0, %v459_v0  ;;  %v354_v6 = vld [vmem:[#allocation7 + $0x28] sm:$0xff]   ;;  %v355_v7 = vld [vmem:[#allocation7 + $0x20] sm:$0xff]   ;;  %v356_v8 = vld [vmem:[#allocation7 + $0x18] sm:$0xff]   ;;  %s270_s11 = sshll.u32 %s461_s10, 4  ;;  %s271_s11 = int_to_ptr.vmem [resolvable:$true] %s270_s11 }
  0x28   :  { %312 = vmatpush3.bf16.msra.mxu0 %v349_v1  ;;  %320 = vmatpush3.bf16.msra.mxu1 %v352_v4  ;;  %v357_v9 = vld [vmem:[#allocation7 + $0x10] sm:$0xff]   ;;  %v358_v10 = vld [vmem:[#allocation7 + $0x8] sm:$0xff]   ;;  %v359_v11 = vld [vmem:[#allocation7] sm:$0xff]   ;;  %s428_s12 = scalar_lea.vmem %s271_s11, 256  ;;  %p433_p2 = scmp.lt.s32.totalorder %s271_s11, %s271_s11 }
  0x29   :  { %313 = vmatprep.subr.bf16.mxu0 %v459_v0  ;;  %321 = vmatprep.subr.bf16.mxu1 %v459_v0  ;;  %v283_v12 = vld [vmem:[%s514_s2] ss:$0 sm:$0xff]  ;;  %p429_p1 = scmp.ne.s32.totalorder %s271_s11, %s428_s12  ;;  %p434_p3 = scmp.lt.s32.totalorder %s428_s12, %s428_s12 }
  0x2a   :  { %v290_v28 = vld [vmem:[%s516_s4] ss:$0 sm:$0xff] }
  0x2b   :  { %p435_p4 = por %p434_p3, %p433_p2 }
  0x2c   :  { %314 = vmatpush3.bf16.msra.mxu0 %v350_v2  ;;  %322 = vmatpush3.bf16.msra.mxu1 %v353_v5 }
  0x2d   :  { %323 = vmatprep.subr.bf16.mxu1 %v459_v0  ;;  %p436_p5 = pnand %p435_p4, %p429_p1 }
  0x2f   :  { %316 = vmatmul.mubr.msk.bf16.vlgmr.msra.gmra.mxu0 %vm93_vm1, %v351_v3 }
  0x30   :  { %324 = vmatpush3.bf16.msra.mxu1 %v354_v6 }
  0x31   :  { %325 = vmatprep.subr.bf16.mxu1 %v459_v0 }
  0x34   :  { %326 = vmatpush3.bf16.msra.mxu1 %v355_v7 }
  0x35   :  { %327 = vmatprep.subr.bf16.mxu1 %v459_v0 }
  0x38   :  { %328 = vmatpush3.bf16.msra.mxu1 %v356_v8 }
  0x39   :  { %329 = vmatprep.subr.bf16.mxu1 %v459_v0 }
  0x3c   :  { %330 = vmatpush3.bf16.msra.mxu1 %v357_v9 }
  0x3d   :  { %331 = vmatprep.subr.bf16.mxu1 %v459_v0 }
  0x40   :  { %332 = vmatpush3.bf16.msra.mxu1 %v358_v10 }
  0x41   :  { %333 = vmatprep.subr.bf16.mxu1 %v459_v0 }
  0x44   :  { %334 = vmatpush3.bf16.msra.mxu1 %v359_v11 }
  0xef   :  { %v131_v13 = vpop.f32.mrf.mxu0 }
  0xf0   :  { %v132_v14 = vadd.f32 %v283_v12, %v131_v13 }
  0xf1   :  { %v317_v15 = vpop.f32.mrf.mxu0 }
  0xf2   :  { %v288_v16 = vmul.f32 -1.442695, %v132_v14 }
  0xf3   :  { %v134_v17 = vpop.f32.mrf.mxu0 }
  0xf4   :  { %360 = vpow2.f32 %v288_v16  ;;  %v135_v18 = vadd.f32 %v283_v12, %v134_v17 }
  0xf5   :  { %v318_v19 = vpop.f32.mrf.mxu0 }
  0xf6   :  { %v289_v20 = vmul.f32 -1.442695, %v135_v18 }
  0xf8   :  { %362 = vpow2.f32 %v289_v20 }
 0x101   :  { %v361_v21 = vpop.eup %360 }
 0x102   :  { %v144_v22 = vadd.f32 1.0, %v361_v21 }
 0x104   :  { %364 = vrcp.f32 %v144_v22 }
 0x105   :  { %v363_v23 = vpop.eup %362 }
 0x106   :  { %v145_v24 = vadd.f32 1.0, %v363_v23 }
 0x108   :  { %366 = vrcp.f32 %v145_v24 }
 0x111   :  { %v365_v25 = vpop.eup %364 }
 0x115   :  { %v367_v26 = vpop.eup %366 }
 0x116   :  { %v150_v27 = vpack.c.bf16 %v367_v26, %v365_v25 }
 0x118   :  { %336 = vmatmul.mubr.bf16.vlgmr.msra.gmra.mxu1 %v150_v27 }
 0x1d8   :  { %v256_v29 = vpop.f32.mrf.mxu1 }
 0x1d9   :  { %v257_v30 = vadd.f32 %v290_v28, %v256_v29 }
 0x1da   :  { %v337_v31 = vpop.f32.mrf.mxu1 }
 0x1db   :  { %263 = vst [vmem:[#allocation8] sm:$0xff] %v257_v30 }
 0x1dc   :  { %v259_v32 = vpop.f32.mrf.mxu1 }
 0x1dd   :  { %v260_v33 = vadd.f32 %v290_v28, %v259_v32 }
 0x1de   :  { %v338_v34 = vpop.f32.mrf.mxu1 }
 0x1df   :  { %264 = vst [vmem:[#allocation8 + $0x8] sm:$0xff] %v260_v33 }
 0x1e0   :  { %439 = shalt.err (!%p436_p5)
}
 0x1e1   :  { %s462_s13 = smov 128   ;;  %s463_s4 = smov 8  }
 0x1e2   :  { %276 = dma.vmem_to_hbm [thread:$0]  %s271_s11, 256, %s517_s5, [#allocation4], %s462_s13, %s462_s13, %s463_s4  }
 0x1e3   :  { %452 = dma.done.wait [#allocation4], 256  }
 0x1e4   :  { %453 = vsyncadd [#allocation4], 4294967040 }
 0x1e5   :  { %280 = vsyncpa [#allocation3], 1 }
 0x1e6   :  { %281 = vsyncpa [#allocation6], 1 }
 0x1e7   :  { %282 = vsyncpa [#allocation4], 1 }

</bundles_post_ra>
